<compile_context>
chip_gen: v5e
topology: v5e:2x2
jax: 0.10.0
libtpu: 0.0.40
codegen_flags: <defaults>
</compile_context>

<pallas_src>
import functools

import jax
import jax.numpy as jnp
from jax import lax
from jax.experimental import pallas as pl
from jax.experimental.pallas import tpu as pltpu

LN_EPS = 1e-5  # nn.LayerNorm default


def _ln_reduce_kernel(x_ref, gamma_ref, beta_ref, w_ref, o_ref, *, eps):
    # x_ref: (tm, K) rows of merged patches (f32)
    x = x_ref[...]
    # LayerNorm over the last dim, kept entirely in f32 on the VPU/EUP.
    mean = jnp.mean(x, axis=-1, keepdims=True)
    xc = x - mean
    var = jnp.mean(xc * xc, axis=-1, keepdims=True)      # biased var (torch LayerNorm)
    h = xc * lax.rsqrt(var + eps) * gamma_ref[...] + beta_ref[...]
    # Reduction matmul: bf16 MXU operands, f32 accumulation.
    o_ref[...] = jnp.dot(h.astype(jnp.bfloat16), w_ref[...],
                         preferred_element_type=jnp.float32).astype(o_ref.dtype)


def _round_up(a, b):
    return (a + b - 1) // b * b


def _merge_windows(x, T, H, W, window_length):
    """(B, L, C) -> (B, L', K) matching the torch strided-slice + concat order."""
    B, L, C = x.shape
    if window_length == 3 and T > 1:
        assert L == T * H * W, "input feature has wrong size"
        x = x.reshape(B, T // 2, 2, H // 2, 2, W // 2, 2, C)
        # axes (B, tt, tp, hh, hp, ww, wp, C) -> (B, tt, hh, ww, wp, hp, tp, C)
        # so channel-block order is wp*4 + hp*2 + tp, i.e. torch's [x0..x7].
        x = jnp.transpose(x, (0, 1, 3, 5, 6, 4, 2, 7))
        return x.reshape(B, -1, 8 * C)
    else:
        # window_length == 2 path.
        # TODO(synk): the torch module's window_length==3 with T==1 branch is
        # internally inconsistent (4C concat fed into LayerNorm(8C)); only the
        # well-defined paths are implemented here.
        assert L == H * W, "input feature has wrong size"
        x = x.reshape(B, H // 2, 2, W // 2, 2, C)
        # axes (B, hh, hp, ww, wp, C) -> (B, hh, ww, wp, hp, C)
        # channel-block order wp*2 + hp, i.e. torch's [x0, x1, x2, x3].
        x = jnp.transpose(x, (0, 1, 3, 4, 2, 5))
        return x.reshape(B, -1, 4 * C)


def patch_merging(x, T, H, W, params, *, dim, window_length):
    """x: (B, L, dim) float.  Returns (B, L', 2*dim) float32."""
    merged = _merge_windows(x.astype(jnp.float32), T, H, W, window_length)
    B, Lp, K = merged.shape
    out_dim = 2 * dim

    gamma = params["gamma"].reshape(1, K).astype(jnp.float32)
    beta = params["beta"].reshape(1, K).astype(jnp.float32)
    # torch Linear weight is (out, in); pre-transpose to (in, out) and cast to
    # bf16 once in the wrapper so the MXU sees bf16 operands.
    w = params["w_reduction"].reshape(out_dim, K).T.astype(jnp.bfloat16)

    rows = merged.reshape(B * Lp, K)
    n = rows.shape[0]
    # Row-tile size: lane-dense K stays whole; tm is a multiple of 8 (sublane).
    tm = min(256, _round_up(n, 8))
    n_pad = _round_up(n, tm)
    if n_pad != n:
        rows = jnp.pad(rows, ((0, n_pad - n), (0, 0)))

    grid = (n_pad // tm,)

    cost = pl.CostEstimate(
        flops=2 * n_pad * K * out_dim,
        transcendentals=0,
        bytes_accessed=(n_pad * K * 4 + n_pad * out_dim * 4
                        + K * out_dim * 2 + 2 * K * 4),
    )

    out = pl.pallas_call(
        functools.partial(_ln_reduce_kernel, eps=LN_EPS),
        out_shape=jax.ShapeDtypeStruct((n_pad, out_dim), jnp.float32),
        grid_spec=pltpu.PrefetchScalarGridSpec(
            num_scalar_prefetch=0,
            grid=grid,
            in_specs=[
                pl.BlockSpec((tm, K), lambda i: (i, 0)),        # merged rows
                pl.BlockSpec((1, K), lambda i: (0, 0)),         # gamma
                pl.BlockSpec((1, K), lambda i: (0, 0)),         # beta
                pl.BlockSpec((K, out_dim), lambda i: (0, 0)),   # reduction weight
            ],
            out_specs=pl.BlockSpec((tm, out_dim), lambda i: (i, 0)),
        ),
        compiler_params=pltpu.CompilerParams(
            dimension_semantics=("parallel",),      # shards row tiles across TCs
            vmem_limit_bytes=32 * 1024 * 1024,      # explicit; safe on v5e/v6e/v7x
        ),
        cost_estimate=cost,
    )(rows, gamma, beta, w)

    return out[:n].reshape(B, Lp, out_dim)


def _reference(x, T, H, W, params, *, dim, window_length):
    """Pure-JAX f32 reference matching the PyTorch forward."""
    merged = _merge_windows(x.astype(jnp.float32), T, H, W, window_length)
    K = merged.shape[-1]
    mean = jnp.mean(merged, axis=-1, keepdims=True)
    var = jnp.var(merged, axis=-1, keepdims=True)
    h = (merged - mean) / jnp.sqrt(var + LN_EPS)
    h = h * params["gamma"].reshape(1, 1, K) + params["beta"].reshape(1, 1, K)
    w = params["w_reduction"].reshape(2 * dim, K)
    return jnp.einsum("blk,ok->blo", h, w)


if __name__ == "__main__":
    key = jax.random.PRNGKey(0)

    def make_params(k, dim, window_length):
        K = (8 if window_length == 3 else 4) * dim
        k1, k2, k3 = jax.random.split(k, 3)
        return {
            "gamma": 1.0 + 0.1 * jax.random.normal(k1, (K,), dtype=jnp.float32),
            "beta": 0.1 * jax.random.normal(k2, (K,), dtype=jnp.float32),
            "w_reduction": 0.05 * jax.random.normal(k3, (2 * dim, K), dtype=jnp.float32),
        }

    # ---- window_length == 2 : (B, H*W, C) -> (B, H/2*W/2, 2C) ----
    B, dim, H, W = 2, 32, 16, 16
    k_x, k_p, key = jax.random.split(key, 3)
    x2 = jax.random.normal(k_x, (B, H * W, dim), dtype=jnp.float32)
    p2 = make_params(k_p, dim, 2)
    out2 = jax.block_until_ready(
        patch_merging(x2, 1, H, W, p2, dim=dim, window_length=2))
    ref2 = jax.block_until_ready(
        _reference(x2, 1, H, W, p2, dim=dim, window_length=2))
    assert out2.shape == (B, (H // 2) * (W // 2), 2 * dim)
    assert jnp.allclose(out2, ref2, rtol=2e-2, atol=2e-2), (
        float(jnp.max(jnp.abs(out2 - ref2))))

    # ---- window_length == 3, T > 1 : (B, T*H*W, C) -> (B, T/2*H/2*W/2, 2C) ----
    B, dim, T, H, W = 2, 16, 4, 8, 8
    k_x, k_p, key = jax.random.split(key, 3)
    x3 = jax.random.normal(k_x, (B, T * H * W, dim), dtype=jnp.float32)
    p3 = make_params(k_p, dim, 3)
    out3 = jax.block_until_ready(
        patch_merging(x3, T, H, W, p3, dim=dim, window_length=3))
    ref3 = jax.block_until_ready(
        _reference(x3, T, H, W, p3, dim=dim, window_length=3))
    assert out3.shape == (B, (T // 2) * (H // 2) * (W // 2), 2 * dim)
    assert jnp.allclose(out3, ref3, rtol=2e-2, atol=2e-2), (
        float(jnp.max(jnp.abs(out3 - ref3))))

    print("KERNEL_OK")
</pallas_src>

<mosaic_0001>
module attributes {stable_mosaic.version = 11 : i64} {
  func.func @_ln_reduce_kernel(%arg0: i32, %arg1: memref<128x128xf32, #tpu.memory_space<vmem>>, %arg2: memref<1x128xf32, #tpu.memory_space<vmem>>, %arg3: memref<1x128xf32, #tpu.memory_space<vmem>>, %arg4: memref<128x64xbf16, #tpu.memory_space<vmem>>, %arg5: memref<128x64xf32, #tpu.memory_space<vmem>>) attributes {dimension_semantics = [#tpu.dimension_semantics<parallel>], iteration_bounds = array<i64: 1>, scalar_prefetch = 0 : i64, scratch_operands = 0 : i64, tpu.core_type = #tpu.core_type<tc>, window_params = [{transform_indices = @transform_0, window_bounds = array<i64: 128, 128>}, {pipeline_mode = #tpu.pipeline_mode<synchronous>, transform_indices = @transform_1, window_bounds = array<i64: 1, 128>}, {pipeline_mode = #tpu.pipeline_mode<synchronous>, transform_indices = @transform_2, window_bounds = array<i64: 1, 128>}, {pipeline_mode = #tpu.pipeline_mode<synchronous>, transform_indices = @transform_3, window_bounds = array<i64: 128, 64>}, {transform_indices = @transform_4, window_bounds = array<i64: 128, 64>}]} {
    %c0 = arith.constant 0 : index
    %c0_0 = arith.constant 0 : index
    %0 = vector.load %arg1[%c0, %c0_0] : memref<128x128xf32, #tpu.memory_space<vmem>>, vector<128x128xf32>
    %cst = arith.constant dense<0.000000e+00> : vector<128xf32>
    %1 = vector.multi_reduction <add>, %0, %cst [1] : vector<128x128xf32> to vector<128xf32>
    %2 = vector.shape_cast %1 : vector<128xf32> to vector<128x1xf32>
    %cst_1 = arith.constant 1.280000e+02 : f32
    %3 = vector.broadcast %cst_1 : f32 to vector<128x1xf32>
    %4 = arith.divf %2, %3 : vector<128x1xf32>
    %5 = vector.broadcast %4 : vector<128x1xf32> to vector<128x128xf32>
    %6 = arith.subf %0, %5 : vector<128x128xf32>
    %7 = arith.mulf %6, %6 : vector<128x128xf32>
    %cst_2 = arith.constant dense<0.000000e+00> : vector<128xf32>
    %8 = vector.multi_reduction <add>, %7, %cst_2 [1] : vector<128x128xf32> to vector<128xf32>
    %9 = vector.shape_cast %8 : vector<128xf32> to vector<128x1xf32>
    %cst_3 = arith.constant 1.280000e+02 : f32
    %10 = vector.broadcast %cst_3 : f32 to vector<128x1xf32>
    %11 = arith.divf %9, %10 : vector<128x1xf32>
    %cst_4 = arith.constant 9.99999974E-6 : f32
    %12 = vector.broadcast %cst_4 : f32 to vector<128x1xf32>
    %13 = arith.addf %11, %12 : vector<128x1xf32>
    %14 = math.rsqrt %13 : vector<128x1xf32>
    %15 = vector.broadcast %14 : vector<128x1xf32> to vector<128x128xf32>
    %16 = arith.mulf %6, %15 : vector<128x128xf32>
    %c0_5 = arith.constant 0 : index
    %c0_6 = arith.constant 0 : index
    %17 = vector.load %arg2[%c0_5, %c0_6] : memref<1x128xf32, #tpu.memory_space<vmem>>, vector<1x128xf32>
    %18 = vector.broadcast %17 : vector<1x128xf32> to vector<128x128xf32>
    %19 = arith.mulf %16, %18 : vector<128x128xf32>
    %c0_7 = arith.constant 0 : index
    %c0_8 = arith.constant 0 : index
    %20 = vector.load %arg3[%c0_7, %c0_8] : memref<1x128xf32, #tpu.memory_space<vmem>>, vector<1x128xf32>
    %21 = vector.broadcast %20 : vector<1x128xf32> to vector<128x128xf32>
    %22 = arith.addf %19, %21 : vector<128x128xf32>
    %23 = arith.truncf %22 : vector<128x128xf32> to vector<128x128xbf16>
    %c0_9 = arith.constant 0 : index
    %c0_10 = arith.constant 0 : index
    %24 = vector.load %arg4[%c0_9, %c0_10] : memref<128x64xbf16, #tpu.memory_space<vmem>>, vector<128x64xbf16>
    %cst_11 = arith.constant dense<0.000000e+00> : vector<128x64xf32>
    %25 = tpu.matmul %23, %24, %cst_11 {dimension_numbers = #tpu.dot_dimension_numbers<[1], [0], [0], [1], [0, 0, 1, 1], [], []>} : vector<128x128xbf16>, vector<128x64xbf16>, vector<128x64xf32> -> vector<128x64xf32>
    %c0_12 = arith.constant 0 : index
    %c0_13 = arith.constant 0 : index
    %26 = vector.load %arg5[%c0_12, %c0_13] : memref<128x64xf32, #tpu.memory_space<vmem>>, vector<128x64xf32>
    tpu.vector_store %arg5[%c0_12, %c0_13], %25 {strides = array<i32>} : memref<128x64xf32, #tpu.memory_space<vmem>>, vector<128x64xf32>,
    return
  }
  func.func @transform_0(%arg0: i32) -> (i32, i32) {
    %c0_i32 = arith.constant 0 : i32
    %c0_i32_0 = arith.constant 0 : i32
    return %arg0, %c0_i32 : i32, i32
  }
  func.func @transform_1(%arg0: i32) -> (i32, i32) {
    %c0_i32 = arith.constant 0 : i32
    %c0_i32_0 = arith.constant 0 : i32
    %c0_i32_1 = arith.constant 0 : i32
    return %c0_i32, %c0_i32_0 : i32, i32
  }
  func.func @transform_2(%arg0: i32) -> (i32, i32) {
    %c0_i32 = arith.constant 0 : i32
    %c0_i32_0 = arith.constant 0 : i32
    %c0_i32_1 = arith.constant 0 : i32
    return %c0_i32, %c0_i32_0 : i32, i32
  }
  func.func @transform_3(%arg0: i32) -> (i32, i32) {
    %c0_i32 = arith.constant 0 : i32
    %c0_i32_0 = arith.constant 0 : i32
    %c0_i32_1 = arith.constant 0 : i32
    return %c0_i32, %c0_i32_0 : i32, i32
  }
  func.func @transform_4(%arg0: i32) -> (i32, i32) {
    %c0_i32 = arith.constant 0 : i32
    %c0_i32_0 = arith.constant 0 : i32
    return %arg0, %c0_i32 : i32, i32
  }
}

</mosaic_0001>

<bundles_post_ra>
// kernel: tpu_custom_call.1
= control target key start
LH: loop header
LB: loop body
LE: loop exit
PB: predicated region body
PF: predicated region fallthrough
CT: control target
= control target key end

     0   :  { %9 = vsyncpa [#allocation3], 0  ;;  %s689_s18 = smov [#allocation2]   ;;  %s690_s20 = smov 128   ;;  %s1312_s0 = inlined_call_operand.hbm [shape: f32[128,128], index: 0, kind: input, shape index: {}]   ;;  %s1313_s1 = inlined_call_operand.vmem [shape: f32[1,128], index: 1, kind: input, shape index: {}]   ;;  %s1314_s2 = inlined_call_operand.vmem [shape: f32[1,128], index: 2, kind: input, shape index: {}]   ;;  %s1315_s3 = inlined_call_operand.vmem [shape: bf16[128,64], index: 3, kind: input, shape index: {}]   ;;  %s1316_s4 = inlined_call_operand.vmem [shape: f32[128,64], index: 4, kind: output, shape index: {}]  }
   0x1   :  { %s14_s17 = sshll.u32 %s1312_s0, 4  ;;  %s16_s19 = sshll.u32 %s689_s18, 4  ;;  %s15_s17 = int_to_ptr.hbm [resolvable:$true] %s14_s17  ;;  %s17_s19 = int_to_ptr.vmem [resolvable:$true] %s16_s19 }
   0x2   :  { %s691_s21 = smov 8  }
   0x3   :  { %22 = dma.hbm_to_vmem [thread:$0]  %s15_s17, 2048, %s17_s19, [#allocation3], %s690_s20, %s690_s20, %s691_s21  }
   0x4   :  { %687 = dma.done.wait [#allocation3], 2048  }
   0x5   :  { %688 = vsyncadd [#allocation3], 4294965248  ;;  %v45_v0 = vld [vmem:[#allocation2 + $0x60] sm:$0xff]  ;;  %v46_v3 = vld [vmem:[#allocation2 + $0x68] sm:$0xff]  ;;  %v692_v16 = vmov 128.0  }
   0x6   :  { %v41_v1 = vld [vmem:[#allocation2 + $0x40] sm:$0xff]  ;;  %73 = vadd.xlane.f32.xlu1 %v45_v0  ;;  %v42_v4 = vld [vmem:[#allocation2 + $0x48] sm:$0xff]  ;;  %v43_v8 = vld [vmem:[#allocation2 + $0x50] sm:$0xff]  ;;  %629 = vrcp.f32 %v692_v16 }
   0x7   :  { %v721_v2 = vld [vmem:[#allocation2] sm:$0xff]  ;;  %65 = vadd.xlane.f32.xlu0 %v41_v1  ;;  %v34_v5 = vld [vmem:[#allocation2 + $0x8] sm:$0xff]  ;;  %v727_v9 = vld [vmem:[#allocation2 + $0x58] sm:$0xff] }
   0x8   :  { %49 = vadd.xlane.f32.xlu2 %v721_v2  ;;  %v37_v6 = vld [vmem:[#allocation2 + $0x20] sm:$0xff]  ;;  %v724_v7 = vld [vmem:[#allocation2 + $0x28] sm:$0xff]  ;;  %v729_v10 = vld [vmem:[#allocation2 + $0x70] sm:$0xff] }
   0x9   :  { %v731_v11 = vld [vmem:[#allocation2 + $0x78] sm:$0xff]  ;;  %v736_v12 = vld [vmem:[#allocation2 + $0x10] sm:$0xff] }
   0xa   :  { %v738_v13 = vld [vmem:[#allocation2 + $0x18] sm:$0xff]  ;;  %v740_v14 = vld [vmem:[#allocation2 + $0x30] sm:$0xff] }
   0xb   :  { %v745_v15 = vld [vmem:[#allocation2 + $0x38] sm:$0xff] }
   0xc   :  { %v630_v17 = vpop.eup %629 }
   0xd   :  { %v82_v18 = vmul.f32 128.0, %v630_v17  ;;  %vm86_vm0 = vweird.f32 %v630_v17 }
   0xe   :  { %75 = vadd.xlane.f32.xlu1 %v46_v3 }
   0xf   :  { %67 = vadd.xlane.f32.xlu0 %v42_v4  ;;  %v83_v19 = vsub.f32 1.0, %v82_v18 }
  0x10   :  { %51 = vadd.xlane.f32.xlu2 %v34_v5 }
  0x11   :  { %v84_v20 = vmul.f32 %v630_v17, %v83_v19 }
  0x13   :  { %v85_v21 = vadd.f32 %v630_v17, %v84_v20 }
  0x15   :  { %v748_v22 = vsel %vm86_vm0, %v630_v17, %v85_v21 }
  0x16   :  { %59 = vadd.xlane.f32.xlu1 %v724_v7 }
  0x17   :  { %57 = vadd.xlane.f32.xlu0 %v37_v6 }
  0x18   :  { %69 = vadd.xlane.f32.xlu2 %v43_v8 }
  0x1e   :  { %77 = vadd.xlane.f32.xlu1 %v729_v10 }
  0x1f   :  { %71 = vadd.xlane.f32.xlu0 %v727_v9 }
  0x20   :  { %79 = vadd.xlane.f32.xlu2 %v731_v11 }
  0x26   :  { %55 = vadd.xlane.f32.xlu1 %v738_v13 }
  0x27   :  { %53 = vadd.xlane.f32.xlu0 %v736_v12 }
  0x28   :  { %61 = vadd.xlane.f32.xlu2 %v740_v14 }
  0x2f   :  { %63 = vadd.xlane.f32.xlu0 %v745_v15 }
  0x79   :  { %v74_v23 = vpop.xlane.xlu1 %73 }
  0x7a   :  { %v66_v24 = vpop.xlane.xlu0 %65  ;;  %v100_v25 = vmul.f32 %v748_v22, %v74_v23 }
  0x7b   :  { %v96_v26 = vmul.f32 %v748_v22, %v66_v24  ;;  %v50_v27 = vpop.xlane.xlu2 %49 }
  0x7c   :  { %v752_v28 = vsub.f32 %v45_v0, %v100_v25  ;;  %v88_v41 = vmul.f32 %v748_v22, %v50_v27  ;;  %v595_v27 = vld [vmem:[%s1315_s3 + $0x20] sm:$0xff] }
  0x7d   :  { %v754_v29 = vsub.f32 %v41_v1, %v96_v26  ;;  %v596_v26 = vld [vmem:[%s1315_s3 + $0x28] sm:$0xff] }
  0x7e   :  { %v132_v31 = vmul.f32 %v752_v28, %v752_v28  ;;  %v777_v47 = vsub.f32 %v721_v2, %v88_v41 }
  0x7f   :  { %v128_v30 = vmul.f32 %v754_v29, %v754_v29 }
  0x80   :  { %160 = vadd.xlane.f32.xlu0 %v132_v31  ;;  %v120_v55 = vmul.f32 %v777_v47, %v777_v47  ;;  %v593_v31 = vld [vmem:[%s1315_s3 + $0x10] sm:$0xff] }
  0x81   :  { %152 = vadd.xlane.f32.xlu1 %v128_v30  ;;  %v76_v32 = vpop.xlane.xlu1 %75  ;;  %v594_v30 = vld [vmem:[%s1315_s3 + $0x18] sm:$0xff] }
  0x82   :  { %v68_v33 = vpop.xlane.xlu0 %67  ;;  %v101_v34 = vmul.f32 %v748_v22, %v76_v32 }
  0x83   :  { %v97_v35 = vmul.f32 %v748_v22, %v68_v33  ;;  %v52_v36 = vpop.xlane.xlu2 %51 }
  0x84   :  { %v89_v37 = vmul.f32 %v748_v22, %v52_v36  ;;  %v763_v38 = vsub.f32 %v46_v3, %v101_v34  ;;  %v592_v36 = vld [vmem:[%s1315_s3 + $0x8] sm:$0xff] }
  0x85   :  { %v765_v39 = vsub.f32 %v42_v4, %v97_v35 }
  0x86   :  { %v767_v40 = vsub.f32 %v34_v5, %v89_v37  ;;  %v133_v42 = vmul.f32 %v763_v38, %v763_v38 }
  0x87   :  { %v129_v43 = vmul.f32 %v765_v39, %v765_v39 }
  0x88   :  { %v121_v44 = vmul.f32 %v767_v40, %v767_v40 }
  0x89   :  { %162 = vadd.xlane.f32.xlu1 %v133_v42  ;;  %154 = vadd.xlane.f32.xlu2 %v129_v43  ;;  %v60_v46 = vpop.xlane.xlu1 %59  ;;  %v591_v42 = vld [vmem:[%s1315_s3] sm:$0xff] }
  0x8a   :  { %138 = vadd.xlane.f32.xlu0 %v121_v44  ;;  %v58_v45 = vpop.xlane.xlu0 %57  ;;  %v93_v52 = vmul.f32 %v748_v22, %v60_v46 }
  0x8b   :  { %v92_v48 = vmul.f32 %v748_v22, %v58_v45  ;;  %v70_v49 = vpop.xlane.xlu2 %69 }
  0x8c   :  { %v98_v50 = vmul.f32 %v748_v22, %v70_v49  ;;  %v793_v57 = vsub.f32 %v724_v7, %v93_v52 }
  0x8d   :  { %v781_v51 = vsub.f32 %v37_v6, %v92_v48 }
  0x8e   :  { %v784_v53 = vsub.f32 %v43_v8, %v98_v50  ;;  %v125_v0 = vmul.f32 %v793_v57, %v793_v57 }
  0x8f   :  { %v124_v54 = vmul.f32 %v781_v51, %v781_v51 }
  0x90   :  { %v130_v56 = vmul.f32 %v784_v53, %v784_v53 }
  0x91   :  { %144 = vadd.xlane.f32.xlu1 %v124_v54  ;;  %136 = vadd.xlane.f32.xlu2 %v120_v55  ;;  %v78_v59 = vpop.xlane.xlu1 %77 }
  0x92   :  { %156 = vadd.xlane.f32.xlu0 %v130_v56  ;;  %v72_v58 = vpop.xlane.xlu0 %71  ;;  %v102_v1 = vmul.f32 %v748_v22, %v78_v59 }
  0x93   :  { %v99_v60 = vmul.f32 %v748_v22, %v72_v58  ;;  %v80_v61 = vpop.xlane.xlu2 %79 }
  0x94   :  { %v103_v62 = vmul.f32 %v748_v22, %v80_v61  ;;  %v811_v5 = vsub.f32 %v729_v10, %v102_v1 }
  0x95   :  { %v798_v63 = vsub.f32 %v727_v9, %v99_v60 }
  0x96   :  { %v804_v2 = vsub.f32 %v731_v11, %v103_v62  ;;  %v134_v17 = vmul.f32 %v811_v5, %v811_v5 }
  0x97   :  { %v131_v3 = vmul.f32 %v798_v63, %v798_v63 }
  0x98   :  { %v135_v4 = vmul.f32 %v804_v2, %v804_v2 }
  0x99   :  { %158 = vadd.xlane.f32.xlu1 %v131_v3  ;;  %146 = vadd.xlane.f32.xlu2 %v125_v0  ;;  %v56_v7 = vpop.xlane.xlu1 %55 }
  0x9a   :  { %166 = vadd.xlane.f32.xlu0 %v135_v4  ;;  %v54_v6 = vpop.xlane.xlu0 %53  ;;  %v91_v18 = vmul.f32 %v748_v22, %v56_v7 }
  0x9b   :  { %v90_v8 = vmul.f32 %v748_v22, %v54_v6  ;;  %v62_v9 = vpop.xlane.xlu2 %61 }
  0x9c   :  { %v94_v11 = vmul.f32 %v748_v22, %v62_v9  ;;  %v829_v21 = vsub.f32 %v738_v13, %v91_v18  ;;  %v598_v13 = vld [vmem:[%s1315_s3 + $0x38] sm:$0xff] }
  0x9d   :  { %v816_v16 = vsub.f32 %v736_v12, %v90_v8  ;;  %600 = vmatpush.bf16.msra.mxu2 %v598_v13  ;;  %601 = vmatpush.bf16.msra.mxu3 %v598_v13 }
  0x9e   :  { %v822_v19 = vsub.f32 %v740_v14, %v94_v11  ;;  %v123_v14 = vmul.f32 %v829_v21, %v829_v21  ;;  %488 = vmatpush.bf16.msra.mxu0 %v598_v13  ;;  %599 = vmatpush.bf16.msra.mxu1 %v598_v13 }
  0x9f   :  { %v122_v10 = vmul.f32 %v816_v16, %v816_v16 }
  0xa0   :  { %v126_v20 = vmul.f32 %v822_v19, %v822_v19 }
  0xa1   :  { %140 = vadd.xlane.f32.xlu1 %v122_v10  ;;  %164 = vadd.xlane.f32.xlu2 %v134_v17 }
  0xa2   :  { %148 = vadd.xlane.f32.xlu0 %v126_v20  ;;  %v64_v12 = vpop.xlane.xlu0 %63 }
  0xa3   :  { %v95_v23 = vmul.f32 %v748_v22, %v64_v12 }
  0xa5   :  { %v833_v24 = vsub.f32 %v745_v15, %v95_v23  ;;  %v597_v15 = vld [vmem:[%s1315_s3 + $0x30] sm:$0xff] }
  0xa6   :  { %603 = vmatpush.bf16.msra.mxu2 %v597_v15  ;;  %604 = vmatpush.bf16.msra.mxu3 %v597_v15 }
  0xa7   :  { %v127_v25 = vmul.f32 %v833_v24, %v833_v24  ;;  %489 = vmatpush.bf16.msra.mxu0 %v597_v15  ;;  %602 = vmatpush.bf16.msra.mxu1 %v597_v15 }
  0xa9   :  { %150 = vadd.xlane.f32.xlu1 %v127_v25  ;;  %142 = vadd.xlane.f32.xlu2 %v123_v14 }
  0xaa   :  { %606 = vmatpush.bf16.msra.mxu2 %v596_v26  ;;  %607 = vmatpush.bf16.msra.mxu3 %v596_v26 }
  0xab   :  { %490 = vmatpush.bf16.msra.mxu0 %v596_v26  ;;  %605 = vmatpush.bf16.msra.mxu1 %v596_v26 }
  0xae   :  { %609 = vmatpush.bf16.msra.mxu2 %v595_v27  ;;  %610 = vmatpush.bf16.msra.mxu3 %v595_v27 }
  0xaf   :  { %491 = vmatpush.bf16.msra.mxu0 %v595_v27  ;;  %608 = vmatpush.bf16.msra.mxu1 %v595_v27 }
  0xb2   :  { %612 = vmatpush.bf16.msra.mxu2 %v594_v30  ;;  %613 = vmatpush.bf16.msra.mxu3 %v594_v30 }
  0xb3   :  { %492 = vmatpush.bf16.msra.mxu0 %v594_v30  ;;  %611 = vmatpush.bf16.msra.mxu1 %v594_v30 }
  0xb6   :  { %615 = vmatpush.bf16.msra.mxu2 %v593_v31  ;;  %616 = vmatpush.bf16.msra.mxu3 %v593_v31 }
  0xb7   :  { %493 = vmatpush.bf16.msra.mxu0 %v593_v31  ;;  %614 = vmatpush.bf16.msra.mxu1 %v593_v31 }
  0xba   :  { %618 = vmatpush.bf16.msra.mxu2 %v592_v36  ;;  %619 = vmatpush.bf16.msra.mxu3 %v592_v36 }
  0xbb   :  { %494 = vmatpush.bf16.msra.mxu0 %v592_v36  ;;  %617 = vmatpush.bf16.msra.mxu1 %v592_v36 }
  0xbe   :  { %621 = vmatpush.bf16.msra.mxu2 %v591_v42  ;;  %622 = vmatpush.bf16.msra.mxu3 %v591_v42 }
  0xbf   :  { %495 = vmatpush.bf16.msra.mxu0 %v591_v42  ;;  %620 = vmatpush.bf16.msra.mxu1 %v591_v42 }
  0xf3   :  { %v161_v33 = vpop.xlane.xlu0 %160 }
  0xf4   :  { %v153_v32 = vpop.xlane.xlu1 %152  ;;  %v180_v35 = vmul.f32 %v161_v33, %v748_v22 }
  0xf5   :  { %v176_v34 = vmul.f32 %v153_v32, %v748_v22 }
  0xf6   :  { %v864_v41 = vadd.f32 1e-05, %v180_v35 }
  0xf7   :  { %v862_v37 = vadd.f32 1e-05, %v176_v34 }
  0xf8   :  { %vm326_vm5 = vweird.f32 %v864_v41 }
  0xf9   :  { %631 = vrsqrt.f32 %v862_v37  ;;  %vm286_vm2 = vweird.f32 %v862_v37 }
  0xfa   :  { %633 = vrsqrt.f32 %v864_v41 }
  0xfc   :  { %v163_v43 = vpop.xlane.xlu1 %162  ;;  %v155_v44 = vpop.xlane.xlu2 %154 }
  0xfd   :  { %v181_v45 = vmul.f32 %v163_v43, %v748_v22  ;;  %v139_v46 = vpop.xlane.xlu0 %138  ;;  %v177_v48 = vmul.f32 %v155_v44, %v748_v22 }
  0xfe   :  { %v169_v49 = vmul.f32 %v139_v46, %v748_v22 }
  0xff   :  { %v874_v50 = vpop.eup %631  ;;  %v876_v52 = vadd.f32 1e-05, %v181_v45  ;;  %v878_v54 = vadd.f32 1e-05, %v177_v48 }
 0x100   :  { %v281_v55 = vmul.f32 %v874_v50, %v862_v37  ;;  %v882_v56 = vadd.f32 1e-05, %v169_v49  ;;  %v884_v58 = vpop.eup %633  ;;  %vm287_vm1 = vweird.f32 %v874_v50 }
 0x101   :  { %635 = vrsqrt.f32 %v876_v52  ;;  %v321_v60 = vmul.f32 %v884_v58, %v864_v41  ;;  %vm327_vm3 = vweird.f32 %v884_v58  ;;  %vm933_vm4 = vmor %vm286_vm2, %vm287_vm1  ;;  %vm336_vm7 = vweird.f32 %v876_v52 }
 0x102   :  { %v282_v59 = vmul.f32 %v874_v50, %v281_v55  ;;  %637 = vrsqrt.f32 %v882_v56  ;;  %vm296_vm8 = vweird.f32 %v878_v54  ;;  %vm216_vm11 = vweird.f32 %v882_v56  ;;  %vm1002_vm13 = vmor %vm326_vm5, %vm327_vm3 }
 0x103   :  { %639 = vrsqrt.f32 %v878_v54  ;;  %v322_v11 = vmul.f32 %v884_v58, %v321_v60 }
 0x104   :  { %v145_v61 = vpop.xlane.xlu1 %144  ;;  %v137_v62 = vpop.xlane.xlu2 %136  ;;  %v283_v0 = vmul.f32 0.5, %v282_v59 }
 0x105   :  { %v172_v1 = vmul.f32 %v145_v61, %v748_v22  ;;  %v157_v3 = vpop.xlane.xlu0 %156  ;;  %v168_v4 = vmul.f32 %v137_v62, %v748_v22  ;;  %v323_v25 = vmul.f32 0.5, %v322_v11 }
 0x106   :  { %v178_v6 = vmul.f32 %v157_v3, %v748_v22  ;;  %v284_v20 = vsub.f32 1.5, %v283_v0 }
 0x107   :  { %v895_v7 = vpop.eup %635  ;;  %v897_v8 = vadd.f32 1e-05, %v172_v1  ;;  %v904_v18 = vadd.f32 1e-05, %v168_v4  ;;  %v324_v45 = vsub.f32 1.5, %v323_v25 }
 0x108   :  { %v899_v9 = vpop.eup %637  ;;  %v902_v17 = vadd.f32 1e-05, %v178_v6  ;;  %v331_v12 = vmul.f32 %v895_v7, %v876_v52  ;;  %v285_v27 = vmul.f32 %v874_v50, %v284_v20  ;;  %vm337_vm10 = vweird.f32 %v895_v7 }
 0x109   :  { %v906_v10 = vpop.eup %639  ;;  %641 = vrsqrt.f32 %v897_v8  ;;  %v211_v14 = vmul.f32 %v899_v9, %v882_v56  ;;  %vm217_vm12 = vweird.f32 %v899_v9  ;;  %vm206_vm15 = vweird.f32 %v904_v18  ;;  %vm1036_vm0 = vmor %vm336_vm7, %vm337_vm10 }
 0x10a   :  { %v291_v23 = vmul.f32 %v906_v10, %v878_v54  ;;  %643 = vrsqrt.f32 %v902_v17  ;;  %v332_v30 = vmul.f32 %v895_v7, %v331_v12  ;;  %v289_v60 = vsel %vm933_vm4, %v874_v50, %v285_v27  ;;  %v968_v12 = vld [vmem:[%s1313_s1] ss:$0 sm:$0xff] }
 0x10b   :  { %645 = vrsqrt.f32 %v904_v18  ;;  %v212_v42 = vmul.f32 %v899_v9, %v211_v14  ;;  %vm297_vm6 = vweird.f32 %v906_v10  ;;  %v368_v20 = vmul.f32 %v289_v60, %v754_v29 }
 0x10c   :  { %v292_v13 = vmul.f32 %v906_v10, %v291_v23  ;;  %v159_v15 = vpop.xlane.xlu1 %158  ;;  %v147_v26 = vpop.xlane.xlu2 %146  ;;  %v333_v55 = vmul.f32 0.5, %v332_v30  ;;  %vm972_vm9 = vmor %vm296_vm8, %vm297_vm6  ;;  %v325_v29 = vmul.f32 %v884_v58, %v324_v45  ;;  %vm306_vm1 = vweird.f32 %v902_v17 }
 0x10d   :  { %v179_v31 = vmul.f32 %v159_v15, %v748_v22  ;;  %v167_v32 = vpop.xlane.xlu0 %166  ;;  %v173_v33 = vmul.f32 %v147_v26, %v748_v22  ;;  %v213_v3 = vmul.f32 0.5, %v212_v42  ;;  %vm246_vm4 = vweird.f32 %v897_v8 }
 0x10e   :  { %v293_v34 = vmul.f32 0.5, %v292_v13  ;;  %v183_v35 = vmul.f32 %v167_v32, %v748_v22  ;;  %v334_v23 = vsub.f32 1.5, %v333_v55 }
 0x10f   :  { %v924_v36 = vpop.eup %641  ;;  %v929_v43 = vadd.f32 1e-05, %v179_v31  ;;  %v940_v37 = vadd.f32 1e-05, %v173_v33  ;;  %v214_v32 = vsub.f32 1.5, %v213_v3 }
 0x110   :  { %v294_v46 = vsub.f32 1.5, %v293_v34  ;;  %v241_v48 = vmul.f32 %v924_v36, %v897_v8  ;;  %v942_v49 = vpop.eup %643  ;;  %v945_v59 = vadd.f32 1e-05, %v183_v35  ;;  %vm247_vm14 = vweird.f32 %v924_v36 }
 0x111   :  { %647 = vrsqrt.f32 %v929_v43  ;;  %v950_v61 = vpop.eup %645  ;;  %v301_v1 = vmul.f32 %v942_v49, %v902_v17  ;;  %vm307_vm2 = vweird.f32 %v942_v49  ;;  %vm256_vm6 = vweird.f32 %v940_v37 }
 0x112   :  { %v295_v62 = vmul.f32 %v906_v10, %v294_v46  ;;  %v242_v0 = vmul.f32 %v924_v36, %v241_v48  ;;  %v201_v4 = vmul.f32 %v950_v61, %v904_v18  ;;  %649 = vrsqrt.f32 %v945_v59 }
 0x113   :  { %v302_v50 = vmul.f32 %v942_v49, %v301_v1  ;;  %651 = vrsqrt.f32 %v940_v37  ;;  %v335_v48 = vmul.f32 %v895_v7, %v334_v23  ;;  %vm207_vm3 = vweird.f32 %v950_v61 }
 0x114   :  { %v141_v6 = vpop.xlane.xlu1 %140  ;;  %v165_v11 = vpop.xlane.xlu2 %164  ;;  %v202_v54 = vmul.f32 %v950_v61, %v201_v4  ;;  %v243_v26 = vmul.f32 0.5, %v242_v0  ;;  %v299_v30 = vsel %vm972_vm9, %v906_v10, %v295_v62  ;;  %v388_v10 = vmul.f32 %v968_v12, %v368_v20  ;;  %v1014_v62 = vld [vmem:[%s1314_s2] ss:$0 sm:$0xff]  ;;  %vm1085_vm9 = vmor %vm216_vm11, %vm217_vm12 }
 0x115   :  { %v170_v25 = vmul.f32 %v141_v6, %v748_v22  ;;  %v149_v13 = vpop.xlane.xlu0 %148  ;;  %v182_v15 = vmul.f32 %v165_v11, %v748_v22  ;;  %v303_v33 = vmul.f32 0.5, %v302_v50  ;;  %v369_v60 = vmul.f32 %v299_v30, %v765_v39  ;;  %vm1099_vm11 = vmor %vm206_vm15, %vm207_vm3 }
 0x116   :  { %v174_v27 = vmul.f32 %v149_v13, %v748_v22  ;;  %v203_v35 = vmul.f32 0.5, %v202_v54  ;;  %v244_v41 = vsub.f32 1.5, %v243_v26  ;;  %v329_v4 = vsel %vm1002_vm13, %v884_v58, %v325_v29  ;;  %vm1121_vm12 = vmor %vm246_vm4, %vm247_vm14 }
 0x117   :  { %v984_v31 = vpop.eup %647  ;;  %v987_v34 = vadd.f32 1e-05, %v170_v25  ;;  %v993_v44 = vadd.f32 1e-05, %v182_v15  ;;  %v1025_v50 = vmul.f32 %v899_v9, %v214_v32  ;;  %v304_v39 = vsub.f32 1.5, %v303_v33  ;;  %vm1133_vm3 = vmor %vm306_vm1, %vm307_vm2 }
 0x118   :  { %v311_v42 = vmul.f32 %v984_v31, %v929_v43  ;;  %v996_v45 = vpop.eup %649  ;;  %v1008_v55 = vadd.f32 1e-05, %v174_v27  ;;  %v204_v58 = vsub.f32 1.5, %v203_v35  ;;  %v389_v52 = vmul.f32 %v968_v12, %v369_v60 }
 0x119   :  { %653 = vrsqrt.f32 %v987_v34  ;;  %v1016_v0 = vpop.eup %651  ;;  %v351_v3 = vmul.f32 %v996_v45, %v945_v59  ;;  %v408_v14 = vadd.f32 %v1014_v62, %v388_v10  ;;  %v339_v54 = vsel %vm1036_vm0, %v895_v7, %v335_v48 }
 0x11a   :  { %v312_v1 = vmul.f32 %v984_v31, %v311_v42  ;;  %v251_v6 = vmul.f32 %v1016_v0, %v940_v37  ;;  %655 = vrsqrt.f32 %v1008_v55  ;;  %v1053_v15 = vmul.f32 %v924_v36, %v244_v41 }
 0x11b   :  { %v352_v20 = vmul.f32 %v996_v45, %v351_v3  ;;  %657 = vrsqrt.f32 %v993_v44  ;;  %v372_v26 = vmul.f32 %v329_v4, %v752_v28  ;;  %v373_v27 = vmul.f32 %v339_v54, %v763_v38 }
 0x11c   :  { %v252_v23 = vmul.f32 %v1016_v0, %v251_v6  ;;  %v151_v25 = vpop.xlane.xlu1 %150  ;;  %v143_v13 = vpop.xlane.xlu2 %142  ;;  %v313_v29 = vmul.f32 0.5, %v312_v1  ;;  %v1060_v32 = vmul.f32 %v942_v49, %v304_v39  ;;  %vm317_vm5 = vweird.f32 %v984_v31 }
 0x11d   :  { %v353_v33 = vmul.f32 0.5, %v352_v20  ;;  %v409_v7 = vadd.f32 %v1014_v62, %v389_v52  ;;  %v205_v42 = vmul.f32 %v950_v61, %v204_v58  ;;  %v175_v38 = vmul.f32 %v151_v25, %v748_v22 }
 0x11e   :  { %v253_v35 = vmul.f32 0.5, %v252_v23  ;;  %v171_v10 = vmul.f32 %v143_v13, %v748_v22  ;;  %vm316_vm7 = vweird.f32 %v929_v43  ;;  %v392_v41 = vmul.f32 %v968_v12, %v372_v26 }
 0x11f   :  { %v1057_v30 = vpop.eup %653  ;;  %v420_v60 = vpack.c.bf16 %v409_v7, %v408_v14  ;;  %v393_v1 = vmul.f32 %v968_v12, %v373_v27  ;;  %v314_v4 = vsub.f32 1.5, %v313_v29  ;;  %vm257_vm8 = vweird.f32 %v1016_v0  ;;  %vm318_vm2 = vmor %vm316_vm7, %vm317_vm5 }
 0x120   :  { %v221_v28 = vmul.f32 %v1057_v30, %v987_v34  ;;  %v1070_v46 = vpop.eup %655  ;;  %v254_v48 = vsub.f32 1.5, %v253_v35  ;;  %v354_v11 = vsub.f32 1.5, %v353_v33  ;;  %vm356_vm10 = vweird.f32 %v945_v59 }
 0x121   :  { %v1075_v3 = vpop.eup %657  ;;  %v261_v22 = vmul.f32 %v1070_v46, %v1008_v55  ;;  %vm357_vm13 = vweird.f32 %v996_v45  ;;  %516 = vmatmul.bf16.vlgmr.msra.gmra.mxu2 %v420_v60  ;;  %v412_v23 = vadd.f32 %v1014_v62, %v392_v41  ;;  %v413_v54 = vadd.f32 %v1014_v62, %v393_v1 }
 0x122   :  { %v222_v39 = vmul.f32 %v1057_v30, %v221_v28  ;;  %v255_v58 = vmul.f32 %v1016_v0, %v254_v48  ;;  %v341_v20 = vmul.f32 %v1075_v3, %v993_v44  ;;  %v1105_v25 = vadd.f32 1e-05, %v175_v38 }
 0x123   :  { %v262_v14 = vmul.f32 %v1070_v46, %v261_v22  ;;  %v1108_v29 = vadd.f32 1e-05, %v171_v10  ;;  %v209_v26 = vsel %vm1099_vm11, %v950_v61, %v205_v42  ;;  %v219_v18 = vsel %vm1085_vm9, %v899_v9, %v1025_v50  ;;  %vm1145_vm9 = vmor %vm256_vm6, %vm257_vm8 }
 0x124   :  { %v223_v52 = vmul.f32 0.5, %v222_v39  ;;  %v342_v13 = vmul.f32 %v1075_v3, %v341_v20  ;;  %v315_v33 = vmul.f32 %v984_v31, %v314_v4  ;;  %vm266_vm15 = vweird.f32 %v1008_v55  ;;  %vm1186_vm6 = vmor %vm356_vm10, %vm357_vm13 }
 0x125   :  { %v263_v35 = vmul.f32 0.5, %v262_v14  ;;  %vm346_vm0 = vweird.f32 %v993_v44  ;;  %v422_v61 = vpack.c.bf16 %v413_v54, %v412_v23  ;;  %659 = vrsqrt.f32 %v1105_v25 }
 0x126   :  { %v355_v9 = vmul.f32 %v996_v45, %v354_v11  ;;  %vm226_vm14 = vweird.f32 %v987_v34  ;;  %vm227_vm4 = vweird.f32 %v1057_v30  ;;  %v343_v50 = vmul.f32 0.5, %v342_v13 }
 0x127   :  { %661 = vrsqrt.f32 %v1108_v29  ;;  %v224_v17 = vsub.f32 1.5, %v223_v52  ;;  %vm347_vm1 = vweird.f32 %v1075_v3  ;;  %526 = vmatmul.bf16.vlgmr.msra.gmra.mxu3 %v422_v61  ;;  %v360_v42 = vmul.f32 %v209_v26, %v777_v47  ;;  %vm1204_vm8 = vmor %vm226_vm14, %vm227_vm4 }
 0x128   :  { %v361_v28 = vmul.f32 %v219_v18, %v767_v40  ;;  %v344_v38 = vsub.f32 1.5, %v343_v50  ;;  %v249_v10 = vsel %vm1121_vm12, %v924_v36, %v1053_v15  ;;  %v259_v37 = vsel %vm1145_vm9, %v1016_v0, %v255_v58  ;;  %vm348_vm7 = vmor %vm346_vm0, %vm347_vm1 }
 0x129   :  { %v309_v48 = vsel %vm1133_vm3, %v942_v49, %v1060_v32  ;;  %v264_v40 = vsub.f32 1.5, %v263_v35  ;;  %v380_v47 = vmul.f32 %v968_v12, %v360_v42  ;;  %v364_v36 = vmul.f32 %v249_v10, %v781_v51 }
 0x12a   :  { %v381_v60 = vmul.f32 %v968_v12, %v361_v28  ;;  %v345_v15 = vmul.f32 %v1075_v3, %v344_v38  ;;  %v365_v0 = vmul.f32 %v259_v37, %v793_v57  ;;  %v319_v41 = vsel %vm318_vm2, %v984_v31, %v315_v33 }
 0x12b   :  { %v370_v49 = vmul.f32 %v309_v48, %v784_v53  ;;  %v660_v32 = vpop.eup %659  ;;  %v400_v1 = vadd.f32 %v1014_v62, %v380_v47  ;;  %v384_v4 = vmul.f32 %v968_v12, %v364_v36  ;;  %v371_v39 = vmul.f32 %v319_v41, %v798_v63 }
 0x12c   :  { %v401_v43 = vadd.f32 %v1014_v62, %v381_v60  ;;  %vm267_vm5 = vweird.f32 %v1070_v46  ;;  %v271_v51 = vmul.f32 %v660_v32, %v1105_v25  ;;  %v385_v57 = vmul.f32 %v968_v12, %v365_v0 }
 0x12d   :  { %v662_v22 = vpop.eup %661  ;;  %v390_v31 = vmul.f32 %v968_v12, %v370_v49  ;;  %v225_v6 = vmul.f32 %v1057_v30, %v224_v17  ;;  %v265_v63 = vmul.f32 %v1070_v46, %v264_v40  ;;  %v404_v23 = vadd.f32 %v1014_v62, %v384_v4  ;;  %vm1217_vm10 = vmor %vm266_vm15, %vm267_vm5 }
 0x12e   :  { %v231_v11 = vmul.f32 %v662_v22, %v1108_v29  ;;  %v416_v58 = vpack.c.bf16 %v401_v43, %v400_v1  ;;  %v272_v20 = vmul.f32 %v660_v32, %v271_v51  ;;  %v405_v59 = vadd.f32 %v1014_v62, %v385_v57 }
 0x12f   :  { %v391_v56 = vmul.f32 %v968_v12, %v371_v39  ;;  %v410_v44 = vadd.f32 %v1014_v62, %v390_v31  ;;  %v349_v54 = vsel %vm348_vm7, %v1075_v3, %v345_v15  ;;  %v359_v13 = vsel %vm1186_vm6, %v996_v45, %v355_v9 }
 0x130   :  { %v232_v14 = vmul.f32 %v662_v22, %v231_v11  ;;  %496 = vmatmul.bf16.vlgmr.msra.gmra.mxu0 %v416_v58  ;;  %v273_v26 = vmul.f32 0.5, %v272_v20  ;;  %v418_v18 = vpack.c.bf16 %v405_v59, %v404_v23  ;;  %v374_v33 = vmul.f32 %v349_v54, %v811_v5 }
 0x131   :  { %v411_v27 = vadd.f32 %v1014_v62, %v391_v56  ;;  %v375_v3 = vmul.f32 %v359_v13, %v804_v2  ;;  %v229_v45 = vsel %vm1204_vm8, %v1057_v30, %v225_v6  ;;  %v269_v55 = vsel %vm1217_vm10, %v1070_v46, %v265_v63 }
 0x132   :  { %v233_v35 = vmul.f32 0.5, %v232_v14  ;;  %v274_v61 = vsub.f32 1.5, %v273_v26  ;;  %vm277_vm13 = vweird.f32 %v660_v32  ;;  %506 = vmatmul.bf16.vlgmr.msra.gmra.mxu1 %v418_v18  ;;  %v394_v9 = vmul.f32 %v968_v12, %v374_v33 }
 0x133   :  { %v421_v8 = vpack.c.bf16 %v411_v27, %v410_v44  ;;  %vm276_vm11 = vweird.f32 %v1105_v25  ;;  %vm237_vm12 = vweird.f32 %v662_v22  ;;  %v395_v2 = vmul.f32 %v968_v12, %v375_v3 }
 0x134   :  { %v234_v5 = vsub.f32 1.5, %v233_v35  ;;  %v275_v50 = vmul.f32 %v660_v32, %v274_v61  ;;  %v414_v30 = vadd.f32 %v1014_v62, %v394_v9  ;;  %v362_v7 = vmul.f32 %v229_v45, %v816_v16  ;;  %vm278_vm15 = vmor %vm276_vm11, %vm277_vm13 }
 0x135   :  { %521 = vmatmul.bf16.gmra.mxu2 %v421_v8  ;;  %v366_v46 = vmul.f32 %v269_v55, %v822_v19  ;;  %vm236_vm0 = vweird.f32 %v1108_v29  ;;  %v415_v42 = vadd.f32 %v1014_v62, %v395_v2  ;;  %vm537_vm14 = vcmask 523264  }
 0x136   :  { %v235_v17 = vmul.f32 %v662_v22, %v234_v5  ;;  %vm238_vm3 = vmor %vm236_vm0, %vm237_vm12  ;;  %v279_v25 = vsel %vm278_vm15, %v660_v32, %v275_v50  ;;  %v382_v48 = vmul.f32 %v968_v12, %v362_v7 }
 0x137   :  { %v423_v28 = vpack.c.bf16 %v415_v42, %v414_v30  ;;  %v367_v10 = vmul.f32 %v279_v25, %v833_v24  ;;  %v386_v16 = vmul.f32 %v968_v12, %v366_v46 }
 0x138   :  { %v239_v38 = vsel %vm238_vm3, %v662_v22, %v235_v17  ;;  %v402_v47 = vadd.f32 %v1014_v62, %v382_v48 }
 0x139   :  { %v363_v37 = vmul.f32 %v239_v38, %v829_v21  ;;  %531 = vmatmul.bf16.gmra.mxu3 %v423_v28  ;;  %v387_v19 = vmul.f32 %v968_v12, %v367_v10  ;;  %v406_v36 = vadd.f32 %v1014_v62, %v386_v16 }
 0x13b   :  { %v383_v40 = vmul.f32 %v968_v12, %v363_v37  ;;  %v407_v29 = vadd.f32 %v1014_v62, %v387_v19 }
 0x13d   :  { %v403_v60 = vadd.f32 %v1014_v62, %v383_v40  ;;  %v419_v15 = vpack.c.bf16 %v407_v29, %v406_v36 }
 0x13f   :  { %v417_v24 = vpack.c.bf16 %v403_v60, %v402_v47 }
 0x141   :  { %501 = vmatmul.bf16.gmra.mxu0 %v417_v24 }
 0x142   :  { %511 = vmatmul.bf16.gmra.mxu1 %v419_v15 }
 0x1a4   :  { %v517_v21 = vpop.f32.mrf.mxu2 }
 0x1a5   :  { %546 = vst.msk [vmem:[%s1316_s4 + $0x40] sm:$0xff] %vm537_vm14, %v517_v21 }
 0x1aa   :  { %v527_v12 = vpop.f32.mrf.mxu3 }
 0x1ab   :  { %550 = vst.msk [vmem:[%s1316_s4 + $0x60] sm:$0xff] %vm537_vm14, %v527_v12 }
 0x1ac   :  { %v519_v62 = vpop.f32.mrf.mxu2 }
 0x1ad   :  { %v497_v0 = vpop.f32.mrf.mxu0  ;;  %547 = vst.msk [vmem:[%s1316_s4 + $0x48] sm:$0xff] %vm537_vm14, %v519_v62 }
 0x1ae   :  { %538 = vst.msk [vmem:[%s1316_s4] sm:$0xff] %vm537_vm14, %v497_v0 }
 0x1af   :  { %v507_v41 = vpop.f32.mrf.mxu1 }
 0x1b0   :  { %542 = vst.msk [vmem:[%s1316_s4 + $0x20] sm:$0xff] %vm537_vm14, %v507_v41 }
 0x1b2   :  { %v529_v49 = vpop.f32.mrf.mxu3 }
 0x1b3   :  { %551 = vst.msk [vmem:[%s1316_s4 + $0x68] sm:$0xff] %vm537_vm14, %v529_v49 }
 0x1b5   :  { %v499_v32 = vpop.f32.mrf.mxu0 }
 0x1b6   :  { %539 = vst.msk [vmem:[%s1316_s4 + $0x8] sm:$0xff] %vm537_vm14, %v499_v32 }
 0x1b7   :  { %v509_v43 = vpop.f32.mrf.mxu1 }
 0x1b8   :  { %v522_v1 = vpop.f32.mrf.mxu2  ;;  %543 = vst.msk [vmem:[%s1316_s4 + $0x28] sm:$0xff] %vm537_vm14, %v509_v43 }
 0x1b9   :  { %548 = vst.msk [vmem:[%s1316_s4 + $0x50] sm:$0xff] %vm537_vm14, %v522_v1 }
 0x1bc   :  { %v532_v4 = vpop.f32.mrf.mxu3 }
 0x1bd   :  { %552 = vst.msk [vmem:[%s1316_s4 + $0x70] sm:$0xff] %vm537_vm14, %v532_v4 }
 0x1be   :  { %v502_v39 = vpop.f32.mrf.mxu0 }
 0x1bf   :  { %540 = vst.msk [vmem:[%s1316_s4 + $0x10] sm:$0xff] %vm537_vm14, %v502_v39  ;;  %v512_v51 = vpop.f32.mrf.mxu1 }
 0x1c0   :  { %v524_v22 = vpop.f32.mrf.mxu2  ;;  %544 = vst.msk [vmem:[%s1316_s4 + $0x30] sm:$0xff] %vm537_vm14, %v512_v51 }
 0x1c1   :  { %549 = vst.msk [vmem:[%s1316_s4 + $0x58] sm:$0xff] %vm537_vm14, %v524_v22 }
 0x1c4   :  { %v534_v57 = vpop.f32.mrf.mxu3 }
 0x1c5   :  { %553 = vst.msk [vmem:[%s1316_s4 + $0x78] sm:$0xff] %vm537_vm14, %v534_v57 }
 0x1c6   :  { %v504_v31 = vpop.f32.mrf.mxu0 }
 0x1c7   :  { %541 = vst.msk [vmem:[%s1316_s4 + $0x18] sm:$0xff] %vm537_vm14, %v504_v31  ;;  %v514_v53 = vpop.f32.mrf.mxu1 }
 0x1c8   :  { %545 = vst.msk [vmem:[%s1316_s4 + $0x38] sm:$0xff] %vm537_vm14, %v514_v53 }
 0x1c9   :  { %558 = vsyncpa [#allocation3], 1 }

</bundles_post_ra>
